<compile_context>
chip_gen: v7x
topology: tpu7x:2x2x1
jax: 0.10.0
libtpu: 0.0.40
codegen_flags: <defaults>
</compile_context>

<pallas_src>
import functools

import jax
import jax.numpy as jnp
from jax.experimental import pallas as pl
from jax.experimental.pallas import tpu as pltpu


def _round_up(x: int, m: int) -> int:
    return ((x + m - 1) // m) * m


def _vmem_cap_bytes() -> int:
    """Chip-aware usable-VMEM cap (falls back to the v7x 64 MiB floor)."""
    try:
        cap = int(getattr(pltpu.get_tpu_info(), "vmem_capacity_bytes", 64 << 20))
    except Exception:  # not on TPU / query unavailable -> conservative default
        cap = 64 << 20
    return max(16 << 20, cap - (8 << 20))  # headroom for compiler temps


# ---------------------------------------------------------------------------
# Kernel 1: fused node projections  h = xW^T + bW  (compute dtype),
#           r = sigmoid(xU^T + bU)  (f32 gate).
# ---------------------------------------------------------------------------
def _proj_kernel(x_ref, w_ref, bw_ref, u_ref, bu_ref, h_ref, r_ref):
    xv = x_ref[...]
    h = jnp.dot(xv, w_ref[...], preferred_element_type=jnp.float32) + bw_ref[...]
    g = jnp.dot(xv, u_ref[...], preferred_element_type=jnp.float32) + bu_ref[...]
    h_ref[...] = h.astype(h_ref.dtype)          # messages input (bf16 default)
    r_ref[...] = jax.nn.sigmoid(g).astype(r_ref.dtype)   # gate, f32


# ---------------------------------------------------------------------------
# Kernel 2: K-tiled message passing + gating   out = (adj @ h) * r
# ---------------------------------------------------------------------------
def _message_gate_kernel(adj_ref, h_ref, r_ref, o_ref, acc_ref):
    k = pl.program_id(1)

    @pl.when(k == 0)
    def _():
        acc_ref[...] = jnp.zeros_like(acc_ref)

    # bf16 x bf16 (default) with f32 accumulation on the MXU.
    acc_ref[...] += jnp.dot(adj_ref[...], h_ref[...],
                            preferred_element_type=jnp.float32)

    @pl.when(k == pl.num_programs(1) - 1)
    def _():
        o_ref[...] = (acc_ref[...] * r_ref[...]).astype(o_ref.dtype)


@functools.partial(jax.jit, static_argnames=("tile", "compute_dtype"))
def gated_graph_conv(x, adj, w_weight, w_bias, u_weight, u_bias,
                     *, tile=512, compute_dtype=jnp.bfloat16):
    """x: [N, C_in], adj: [N, N], w/u_weight: [C_out, C_in] (PyTorch layout)."""
    n, c_in = x.shape
    c_out = w_weight.shape[0]
    out_dtype = x.dtype
    cdt = jnp.dtype(compute_dtype)
    f32 = jnp.float32

    # ---- TPU-friendly padded sizes ---------------------------------------
    c_pad = _round_up(c_out, 128)          # lane-dense output / MXU width
    c_in_pad = _round_up(c_in, 128)
    n128 = _round_up(n, 128)

    isz = cdt.itemsize
    osz = jnp.dtype(out_dtype).itemsize

    # ---- tile selection: multiple of 128, capped by the padded graph size,
    #      shrunk (not clamped) until the O(tile^2) budget fits the chip cap.
    tile = max(128, min(int(tile), n128))
    tile = (tile // 128) * 128

    def mp_budget(t):
        return (2 * t * t * isz            # adj tiles (double-buffered)
                + 2 * t * c_pad * isz      # h tiles
                + 2 * t * c_pad * 4        # r tiles (f32)
                + 2 * t * c_pad * osz      # output tiles
                + t * c_pad * 4)           # f32 accumulator scratch

    cap = _vmem_cap_bytes()
    while mp_budget(tile) + (4 << 20) > cap and tile > 128:
        tile = max(128, ((tile // 2) // 128) * 128)
    if mp_budget(tile) + (4 << 20) > cap:
        raise ValueError(
            f"GGCN minimum tile (128) needs {mp_budget(128)} B VMEM, cap {cap} B")

    n_pad = _round_up(n, tile)

    # ---- zero-padded operands (zero adj cols cancel bias-only padded h rows;
    #      padded output rows/cols are sliced off at the end).
    xp = jnp.zeros((n_pad, c_in_pad), f32).at[:n, :c_in].set(x.astype(f32))
    adjp = jnp.zeros((n_pad, n_pad), cdt).at[:n, :n].set(adj.astype(cdt))
    wp = jnp.zeros((c_in_pad, c_pad), f32).at[:c_in, :c_out].set(
        jnp.asarray(w_weight, f32).T)
    up = jnp.zeros((c_in_pad, c_pad), f32).at[:c_in, :c_out].set(
        jnp.asarray(u_weight, f32).T)
    bwp = jnp.zeros((1, c_pad), f32).at[0, :c_out].set(jnp.asarray(w_bias, f32))
    bup = jnp.zeros((1, c_pad), f32).at[0, :c_out].set(jnp.asarray(u_bias, f32))

    # ------------------------------------------------------------------ #
    # Kernel 1: projections (small dense matmuls, fully parallel rows).   #
    # ------------------------------------------------------------------ #
    proj_budget = (2 * tile * c_in_pad * 4          # x tiles
                   + 4 * c_in_pad * c_pad * 4       # W, U (double-buffered)
                   + 4 * c_pad * 4                  # biases
                   + 2 * tile * c_pad * isz         # h out tiles
                   + 2 * tile * c_pad * 4)          # r out tiles

    h_pad, r_pad = pl.pallas_call(
        _proj_kernel,
        out_shape=(jax.ShapeDtypeStruct((n_pad, c_pad), cdt),
                   jax.ShapeDtypeStruct((n_pad, c_pad), f32)),
        grid=(n_pad // tile,),
        in_specs=[
            pl.BlockSpec((tile, c_in_pad), lambda i: (i, 0)),     # x tile
            pl.BlockSpec((c_in_pad, c_pad), lambda i: (0, 0)),    # W^T
            pl.BlockSpec((1, c_pad), lambda i: (0, 0)),           # b_W
            pl.BlockSpec((c_in_pad, c_pad), lambda i: (0, 0)),    # U^T
            pl.BlockSpec((1, c_pad), lambda i: (0, 0)),           # b_U
        ],
        out_specs=(pl.BlockSpec((tile, c_pad), lambda i: (i, 0)),
                   pl.BlockSpec((tile, c_pad), lambda i: (i, 0))),
        compiler_params=pltpu.CompilerParams(
            dimension_semantics=("parallel",),
            vmem_limit_bytes=int(min(max(proj_budget + (4 << 20), 16 << 20), cap)),
        ),
        cost_estimate=pl.CostEstimate(
            flops=int(4 * n_pad * c_in_pad * c_pad),
            transcendentals=int(n_pad * c_pad),
            bytes_accessed=int(xp.size * 4 + 2 * wp.size * 4
                               + n_pad * c_pad * (isz + 4)),
        ),
    )(xp, wp, bwp, up, bup)

    # ------------------------------------------------------------------ #
    # Kernel 2: K-tiled adj @ h with f32 accumulation, gated store.       #
    # ------------------------------------------------------------------ #
    out = pl.pallas_call(
        _message_gate_kernel,
        out_shape=jax.ShapeDtypeStruct((n_pad, c_pad), out_dtype),
        grid=(n_pad // tile, n_pad // tile),
        in_specs=[
            pl.BlockSpec((tile, tile), lambda i, k: (i, k)),      # adj tile
            pl.BlockSpec((tile, c_pad), lambda i, k: (k, 0)),     # h tile
            pl.BlockSpec((tile, c_pad), lambda i, k: (i, 0)),     # r tile
        ],
        out_specs=pl.BlockSpec((tile, c_pad), lambda i, k: (i, 0)),
        scratch_shapes=[pltpu.VMEM((tile, c_pad), jnp.float32)],  # accumulator
        compiler_params=pltpu.CompilerParams(
            dimension_semantics=("parallel", "arbitrary"),
            vmem_limit_bytes=int(min(max(mp_budget(tile) + (4 << 20), 16 << 20),
                                     cap)),
        ),
        cost_estimate=pl.CostEstimate(
            flops=int(2 * n_pad * n_pad * c_pad + n_pad * c_pad),
            transcendentals=0,
            bytes_accessed=int(adjp.size * isz
                               + n_pad * c_pad * (isz + 4 + osz)),
        ),
    )(adjp, h_pad, r_pad)

    return out[:n, :c_out]


def ggcn_reference(x, adj, w_weight, w_bias, u_weight, u_bias):
    h = x @ w_weight.T + w_bias
    m = adj @ h
    r = jax.nn.sigmoid(x @ u_weight.T + u_bias)
    return m * r


if __name__ == "__main__":
    key = jax.random.PRNGKey(0)
    k_x, k_adj, k_w, k_bw, k_u, k_bu = jax.random.split(key, 6)

    N = 16            # number of graph nodes
    C_IN = 32         # in_channels
    C_OUT = 32        # out_channels

    x = jax.random.normal(k_x, (N, C_IN), dtype=jnp.float32)
    adj = jax.random.uniform(k_adj, (N, N), dtype=jnp.float32)

    # Deterministic synthetic parameters (PyTorch nn.Linear layout: [out, in]).
    w_weight = jax.random.normal(k_w, (C_OUT, C_IN), dtype=jnp.float32) * 0.1
    w_bias = jax.random.normal(k_bw, (C_OUT,), dtype=jnp.float32) * 0.1
    u_weight = jax.random.normal(k_u, (C_OUT, C_IN), dtype=jnp.float32) * 0.1
    u_bias = jax.random.normal(k_bu, (C_OUT,), dtype=jnp.float32) * 0.1

    ref = ggcn_reference(x, adj, w_weight, w_bias, u_weight, u_bias)

    # Exactness check: f32 compute path, tight tolerance.
    out_f32 = gated_graph_conv(x, adj, w_weight, w_bias, u_weight, u_bias,
                               compute_dtype=jnp.float32)
    out_f32 = jax.block_until_ready(out_f32)
    assert out_f32.shape == (N, C_OUT)
    assert jnp.allclose(out_f32, ref, atol=1e-4, rtol=1e-4), "f32 path mismatch"

    # Default path: bf16 adj/h streaming (f32 accumulation), looser tolerance.
    out_bf16 = gated_graph_conv(x, adj, w_weight, w_bias, u_weight, u_bias)
    out_bf16 = jax.block_until_ready(out_bf16)
    assert out_bf16.shape == (N, C_OUT)
    assert jnp.allclose(out_bf16, ref, atol=3e-2, rtol=3e-2), "bf16 path mismatch"

    print("KERNEL_OK")
</pallas_src>

<mosaic_0001>
module attributes {stable_mosaic.version = 11 : i64} {
  func.func @_proj_kernel(%arg0: i32, %arg1: memref<128x128xf32, #tpu.memory_space<vmem>>, %arg2: memref<128x128xf32, #tpu.memory_space<vmem>>, %arg3: memref<1x128xf32, #tpu.memory_space<vmem>>, %arg4: memref<128x128xf32, #tpu.memory_space<vmem>>, %arg5: memref<1x128xf32, #tpu.memory_space<vmem>>, %arg6: memref<128x128xf32, #tpu.memory_space<vmem>>, %arg7: memref<128x128xf32, #tpu.memory_space<vmem>>) attributes {dimension_semantics = [#tpu.dimension_semantics<parallel>], iteration_bounds = array<i64: 1>, scalar_prefetch = 0 : i64, scratch_operands = 0 : i64, tpu.core_type = #tpu.core_type<tc>, window_params = [{transform_indices = @transform_0, window_bounds = array<i64: 128, 128>}, {pipeline_mode = #tpu.pipeline_mode<synchronous>, transform_indices = @transform_1, window_bounds = array<i64: 128, 128>}, {pipeline_mode = #tpu.pipeline_mode<synchronous>, transform_indices = @transform_2, window_bounds = array<i64: 1, 128>}, {pipeline_mode = #tpu.pipeline_mode<synchronous>, transform_indices = @transform_3, window_bounds = array<i64: 128, 128>}, {pipeline_mode = #tpu.pipeline_mode<synchronous>, transform_indices = @transform_4, window_bounds = array<i64: 1, 128>}, {transform_indices = @transform_5, window_bounds = array<i64: 128, 128>}, {transform_indices = @transform_6, window_bounds = array<i64: 128, 128>}]} {
    %c0 = arith.constant 0 : index
    %c0_0 = arith.constant 0 : index
    %0 = vector.load %arg1[%c0, %c0_0] : memref<128x128xf32, #tpu.memory_space<vmem>>, vector<128x128xf32>
    %c0_1 = arith.constant 0 : index
    %c0_2 = arith.constant 0 : index
    %1 = vector.load %arg2[%c0_1, %c0_2] : memref<128x128xf32, #tpu.memory_space<vmem>>, vector<128x128xf32>
    %cst = arith.constant dense<0.000000e+00> : vector<128x128xf32>
    %2 = tpu.matmul %0, %1, %cst {dimension_numbers = #tpu.dot_dimension_numbers<[1], [0], [0], [1], [0, 0, 1, 1], [], []>} : vector<128x128xf32>, vector<128x128xf32>, vector<128x128xf32> -> vector<128x128xf32>
    %c0_3 = arith.constant 0 : index
    %c0_4 = arith.constant 0 : index
    %3 = vector.load %arg3[%c0_3, %c0_4] : memref<1x128xf32, #tpu.memory_space<vmem>>, vector<1x128xf32>
    %4 = vector.broadcast %3 : vector<1x128xf32> to vector<128x128xf32>
    %5 = arith.addf %2, %4 : vector<128x128xf32>
    %c0_5 = arith.constant 0 : index
    %c0_6 = arith.constant 0 : index
    %6 = vector.load %arg4[%c0_5, %c0_6] : memref<128x128xf32, #tpu.memory_space<vmem>>, vector<128x128xf32>
    %cst_7 = arith.constant dense<0.000000e+00> : vector<128x128xf32>
    %7 = tpu.matmul %0, %6, %cst_7 {dimension_numbers = #tpu.dot_dimension_numbers<[1], [0], [0], [1], [0, 0, 1, 1], [], []>} : vector<128x128xf32>, vector<128x128xf32>, vector<128x128xf32> -> vector<128x128xf32>
    %c0_8 = arith.constant 0 : index
    %c0_9 = arith.constant 0 : index
    %8 = vector.load %arg5[%c0_8, %c0_9] : memref<1x128xf32, #tpu.memory_space<vmem>>, vector<1x128xf32>
    %9 = vector.broadcast %8 : vector<1x128xf32> to vector<128x128xf32>
    %10 = arith.addf %7, %9 : vector<128x128xf32>
    %c0_10 = arith.constant 0 : index
    %c0_11 = arith.constant 0 : index
    %11 = vector.load %arg6[%c0_10, %c0_11] : memref<128x128xf32, #tpu.memory_space<vmem>>, vector<128x128xf32>
    tpu.vector_store %arg6[%c0_10, %c0_11], %5 {strides = array<i32>} : memref<128x128xf32, #tpu.memory_space<vmem>>, vector<128x128xf32>,
    %12 = arith.negf %10 : vector<128x128xf32>
    %13 = math.exp %12 : vector<128x128xf32>
    %cst_12 = arith.constant 1.000000e+00 : f32
    %14 = vector.broadcast %cst_12 : f32 to vector<128x128xf32>
    %15 = arith.addf %14, %13 : vector<128x128xf32>
    %16 = arith.divf %14, %15 : vector<128x128xf32>
    %c0_13 = arith.constant 0 : index
    %c0_14 = arith.constant 0 : index
    %17 = vector.load %arg7[%c0_13, %c0_14] : memref<128x128xf32, #tpu.memory_space<vmem>>, vector<128x128xf32>
    tpu.vector_store %arg7[%c0_13, %c0_14], %16 {strides = array<i32>} : memref<128x128xf32, #tpu.memory_space<vmem>>, vector<128x128xf32>,
    return
  }
  func.func @transform_0(%arg0: i32) -> (i32, i32) {
    %c0_i32 = arith.constant 0 : i32
    %c0_i32_0 = arith.constant 0 : i32
    return %arg0, %c0_i32 : i32, i32
  }
  func.func @transform_1(%arg0: i32) -> (i32, i32) {
    %c0_i32 = arith.constant 0 : i32
    %c0_i32_0 = arith.constant 0 : i32
    %c0_i32_1 = arith.constant 0 : i32
    return %c0_i32, %c0_i32_0 : i32, i32
  }
  func.func @transform_2(%arg0: i32) -> (i32, i32) {
    %c0_i32 = arith.constant 0 : i32
    %c0_i32_0 = arith.constant 0 : i32
    %c0_i32_1 = arith.constant 0 : i32
    return %c0_i32, %c0_i32_0 : i32, i32
  }
  func.func @transform_3(%arg0: i32) -> (i32, i32) {
    %c0_i32 = arith.constant 0 : i32
    %c0_i32_0 = arith.constant 0 : i32
    %c0_i32_1 = arith.constant 0 : i32
    return %c0_i32, %c0_i32_0 : i32, i32
  }
  func.func @transform_4(%arg0: i32) -> (i32, i32) {
    %c0_i32 = arith.constant 0 : i32
    %c0_i32_0 = arith.constant 0 : i32
    %c0_i32_1 = arith.constant 0 : i32
    return %c0_i32, %c0_i32_0 : i32, i32
  }
  func.func @transform_5(%arg0: i32) -> (i32, i32) {
    %c0_i32 = arith.constant 0 : i32
    %c0_i32_0 = arith.constant 0 : i32
    return %arg0, %c0_i32 : i32, i32
  }
  func.func @transform_6(%arg0: i32) -> (i32, i32) {
    %c0_i32 = arith.constant 0 : i32
    %c0_i32_0 = arith.constant 0 : i32
    return %arg0, %c0_i32 : i32, i32
  }
}

module attributes {stable_mosaic.version = 11 : i64} {
  func.func @_message_gate_kernel(%arg0: i32, %arg1: i32, %arg2: memref<128x128xf32, #tpu.memory_space<vmem>>, %arg3: memref<128x128xf32, #tpu.memory_space<vmem>>, %arg4: memref<128x128xf32, #tpu.memory_space<vmem>>, %arg5: memref<128x128xf32, #tpu.memory_space<vmem>>, %arg6: memref<128x128xf32, #tpu.memory_space<vmem>>) attributes {dimension_semantics = [#tpu.dimension_semantics<parallel>, #tpu.dimension_semantics<arbitrary>], iteration_bounds = array<i64: 1, 1>, scalar_prefetch = 0 : i64, scratch_operands = 1 : i64, tpu.core_type = #tpu.core_type<tc>, window_params = [{transform_indices = @transform_0, window_bounds = array<i64: 128, 128>}, {transform_indices = @transform_1, window_bounds = array<i64: 128, 128>}, {transform_indices = @transform_2, window_bounds = array<i64: 128, 128>}, {transform_indices = @transform_3, window_bounds = array<i64: 128, 128>}]} {
    %c0_i32 = arith.constant 0 : i32
    %0 = arith.cmpi eq, %arg1, %c0_i32 : i32
    %1 = arith.extui %0 : i1 to i32
    %c0_i32_0 = arith.constant 0 : i32
    %2 = arith.cmpi ne, %1, %c0_i32_0 : i32
    scf.if %2 {
      %cst_10 = arith.constant 0.000000e+00 : f32
      %12 = vector.broadcast %cst_10 : f32 to vector<128x128xf32>
      %c0_11 = arith.constant 0 : index
      %c0_12 = arith.constant 0 : index
      %13 = vector.load %arg6[%c0_11, %c0_12] : memref<128x128xf32, #tpu.memory_space<vmem>>, vector<128x128xf32>
      tpu.vector_store %arg6[%c0_11, %c0_12], %12 {strides = array<i32>} : memref<128x128xf32, #tpu.memory_space<vmem>>, vector<128x128xf32>,
    } else {
    }
    %c0 = arith.constant 0 : index
    %c0_1 = arith.constant 0 : index
    %3 = vector.load %arg6[%c0, %c0_1] : memref<128x128xf32, #tpu.memory_space<vmem>>, vector<128x128xf32>
    %c0_2 = arith.constant 0 : index
    %c0_3 = arith.constant 0 : index
    %4 = vector.load %arg2[%c0_2, %c0_3] : memref<128x128xf32, #tpu.memory_space<vmem>>, vector<128x128xf32>
    %c0_4 = arith.constant 0 : index
    %c0_5 = arith.constant 0 : index
    %5 = vector.load %arg3[%c0_4, %c0_5] : memref<128x128xf32, #tpu.memory_space<vmem>>, vector<128x128xf32>
    %cst = arith.constant dense<0.000000e+00> : vector<128x128xf32>
    %6 = tpu.matmul %4, %5, %cst {dimension_numbers = #tpu.dot_dimension_numbers<[1], [0], [0], [1], [0, 0, 1, 1], [], []>} : vector<128x128xf32>, vector<128x128xf32>, vector<128x128xf32> -> vector<128x128xf32>
    %7 = arith.addf %3, %6 : vector<128x128xf32>
    %c0_6 = arith.constant 0 : index
    %c0_7 = arith.constant 0 : index
    %8 = vector.load %arg6[%c0_6, %c0_7] : memref<128x128xf32, #tpu.memory_space<vmem>>, vector<128x128xf32>
    tpu.vector_store %arg6[%c0_6, %c0_7], %7 {strides = array<i32>} : memref<128x128xf32, #tpu.memory_space<vmem>>, vector<128x128xf32>,
    %c0_i32_8 = arith.constant 0 : i32
    %9 = arith.cmpi eq, %arg1, %c0_i32_8 : i32
    %10 = arith.extui %9 : i1 to i32
    %c0_i32_9 = arith.constant 0 : i32
    %11 = arith.cmpi ne, %10, %c0_i32_9 : i32
    scf.if %11 {
      %c0_10 = arith.constant 0 : index
      %c0_11 = arith.constant 0 : index
      %12 = vector.load %arg6[%c0_10, %c0_11] : memref<128x128xf32, #tpu.memory_space<vmem>>, vector<128x128xf32>
      %c0_12 = arith.constant 0 : index
      %c0_13 = arith.constant 0 : index
      %13 = vector.load %arg4[%c0_12, %c0_13] : memref<128x128xf32, #tpu.memory_space<vmem>>, vector<128x128xf32>
      %14 = arith.mulf %12, %13 : vector<128x128xf32>
      %c0_14 = arith.constant 0 : index
      %c0_15 = arith.constant 0 : index
      %15 = vector.load %arg5[%c0_14, %c0_15] : memref<128x128xf32, #tpu.memory_space<vmem>>, vector<128x128xf32>
      tpu.vector_store %arg5[%c0_14, %c0_15], %14 {strides = array<i32>} : memref<128x128xf32, #tpu.memory_space<vmem>>, vector<128x128xf32>,
    } else {
    }
    return
  }
  func.func @transform_0(%arg0: i32, %arg1: i32) -> (i32, i32) {
    %c0_i32 = arith.constant 0 : i32
    return %arg0, %arg1 : i32, i32
  }
  func.func @transform_1(%arg0: i32, %arg1: i32) -> (i32, i32) {
    %c0_i32 = arith.constant 0 : i32
    %c0_i32_0 = arith.constant 0 : i32
    return %arg1, %c0_i32 : i32, i32
  }
  func.func @transform_2(%arg0: i32, %arg1: i32) -> (i32, i32) {
    %c0_i32 = arith.constant 0 : i32
    %c0_i32_0 = arith.constant 0 : i32
    return %arg0, %c0_i32 : i32, i32
  }
  func.func @transform_3(%arg0: i32, %arg1: i32) -> (i32, i32) {
    %c0_i32 = arith.constant 0 : i32
    %c0_i32_0 = arith.constant 0 : i32
    return %arg0, %c0_i32 : i32, i32
  }
}

</mosaic_0001>

<bundles_post_ra>
// kernel: gated_graph_conv.2
= control target key start
LH: loop header
LB: loop body
LE: loop exit
PB: predicated region body
PF: predicated region fallthrough
CT: control target
= control target key end

     0   :  { %s1149_s3 = inlined_call_operand.vmem [shape: f32[128,128], index: 3, kind: input, shape index: {}]   ;;  %s1150_s1 = inlined_call_operand.vmem [shape: f32[128,128], index: 1, kind: input, shape index: {}]   ;;  %s1151_s0 = inlined_call_operand.vmem [shape: f32[128,128], index: 0, kind: input, shape index: {}]   ;;  %s1152_s4 = inlined_call_operand.vmem [shape: f32[1,128], index: 4, kind: input, shape index: {}]   ;;  %s1153_s2 = inlined_call_operand.vmem [shape: f32[1,128], index: 2, kind: input, shape index: {}]   ;;  %s1154_s5 = inlined_call_operand.vmem [shape: f32[128,128], index: 5, kind: output, shape index: {0}]   ;;  %s1155_s6 = inlined_call_operand.vmem [shape: f32[128,128], index: 6, kind: output, shape index: {1}]  }
   0x1   :  { %v206_v0 = vld [vmem:[%s1149_s3] sm:$0xff]  ;;  %v207_v1 = vld [vmem:[%s1149_s3 + $0x8] sm:$0xff]  ;;  %v208_v2 = vld [vmem:[%s1149_s3 + $0x10] sm:$0xff] }
   0x2   :  { %v736_v3 = vpack.c.bf16 %v207_v1, %v206_v0  ;;  %v209_v4 = vld [vmem:[%s1149_s3 + $0x18] sm:$0xff]  ;;  %v210_v6 = vld [vmem:[%s1149_s3 + $0x20] sm:$0xff]  ;;  %v211_v7 = vld [vmem:[%s1149_s3 + $0x28] sm:$0xff] }
   0x3   :  { %v740_v5 = vpack.c.bf16 %v209_v4, %v208_v2  ;;  %v38_v8 = vld [vmem:[%s1150_s1] sm:$0xff]  ;;  %v744_v9 = vpack.c.bf16 %v211_v7, %v210_v6  ;;  %v212_v10 = vld [vmem:[%s1149_s3 + $0x30] sm:$0xff]  ;;  %v213_v11 = vld [vmem:[%s1149_s3 + $0x38] sm:$0xff] }
   0x4   :  { %737 = vmatprep.subr.bf16.mxu1 %v736_v3  ;;  %v39_v12 = vld [vmem:[%s1150_s1 + $0x8] sm:$0xff]  ;;  %v40_v14 = vld [vmem:[%s1150_s1 + $0x10] sm:$0xff]  ;;  %v41_v15 = vld [vmem:[%s1150_s1 + $0x18] sm:$0xff]  ;;  %v748_v20 = vpack.c.bf16 %v213_v11, %v212_v10 }
   0x5   :  { %739 = vmatpush3.bf16.msra.mxu1 %v736_v3  ;;  %v704_v13 = vpack.c.bf16 %v39_v12, %v38_v8  ;;  %v22_v16 = vld [vmem:[%s1151_s0] sm:$0xff]  ;;  %v708_v17 = vpack.c.bf16 %v41_v15, %v40_v14  ;;  %v43_v19 = vld [vmem:[%s1150_s1 + $0x28] sm:$0xff]  ;;  %v44_v24 = vld [vmem:[%s1150_s1 + $0x30] sm:$0xff] }
   0x6   :  { %741 = vmatprep.subr.bf16.mxu1 %v740_v5  ;;  %680 = vmatprep.mubr.f32.mxu1 %v22_v16  ;;  %v42_v18 = vld [vmem:[%s1150_s1 + $0x20] sm:$0xff]  ;;  %v215_v22 = vld [vmem:[%s1149_s3 + $0x48] sm:$0xff]  ;;  %v45_v25 = vld [vmem:[%s1150_s1 + $0x38] sm:$0xff] }
   0x7   :  { %624 = vmatprep.mubr.f32.mxu0 %v22_v16  ;;  %705 = vmatprep.subr.bf16.mxu0 %v704_v13  ;;  %v214_v21 = vld [vmem:[%s1149_s3 + $0x40] sm:$0xff]  ;;  %v712_v23 = vpack.c.bf16 %v43_v19, %v42_v18  ;;  %v216_v27 = vld [vmem:[%s1149_s3 + $0x50] sm:$0xff]  ;;  %v217_v28 = vld [vmem:[%s1149_s3 + $0x58] sm:$0xff]  ;;  %v716_v29 = vpack.c.bf16 %v45_v25, %v44_v24 }
   0x8   :  { %707 = vmatpush3.bf16.msra.mxu0 %v704_v13  ;;  %v752_v26 = vpack.c.bf16 %v215_v22, %v214_v21  ;;  %v46_v30 = vld [vmem:[%s1150_s1 + $0x40] sm:$0xff]  ;;  %v47_v31 = vld [vmem:[%s1150_s1 + $0x48] sm:$0xff]  ;;  %v756_v32 = vpack.c.bf16 %v217_v28, %v216_v27  ;;  %v48_v36 = vld [vmem:[%s1150_s1 + $0x50] sm:$0xff] }
   0x9   :  { %743 = vmatpush3.bf16.msra.mxu1 %v740_v5  ;;  %709 = vmatprep.subr.bf16.mxu0 %v708_v17  ;;  %v218_v33 = vld [vmem:[%s1149_s3 + $0x60] sm:$0xff]  ;;  %v219_v34 = vld [vmem:[%s1149_s3 + $0x68] sm:$0xff]  ;;  %v720_v35 = vpack.c.bf16 %v47_v31, %v46_v30  ;;  %v49_v37 = vld [vmem:[%s1150_s1 + $0x58] sm:$0xff] }
   0xa   :  { %745 = vmatprep.subr.bf16.mxu1 %v744_v9  ;;  %v760_v38 = vpack.c.bf16 %v219_v34, %v218_v33  ;;  %v220_v39 = vld [vmem:[%s1149_s3 + $0x70] sm:$0xff]  ;;  %v221_v40 = vld [vmem:[%s1149_s3 + $0x78] sm:$0xff]  ;;  %v724_v41 = vpack.c.bf16 %v49_v37, %v48_v36  ;;  %v50_v42 = vld [vmem:[%s1150_s1 + $0x60] sm:$0xff] }
   0xb   :  { %v51_v43 = vld [vmem:[%s1150_s1 + $0x68] sm:$0xff]  ;;  %v764_v44 = vpack.c.bf16 %v221_v40, %v220_v39  ;;  %v52_v46 = vld [vmem:[%s1150_s1 + $0x70] sm:$0xff]  ;;  %v53_v47 = vld [vmem:[%s1150_s1 + $0x78] sm:$0xff] }
   0xc   :  { %711 = vmatpush3.bf16.msra.mxu0 %v708_v17  ;;  %v728_v45 = vpack.c.bf16 %v51_v43, %v50_v42  ;;  %v732_v48 = vpack.c.bf16 %v53_v47, %v52_v46  ;;  %v23_v49 = vld [vmem:[%s1151_s0 + $0x8] sm:$0xff]  ;;  %v24_v50 = vld [vmem:[%s1151_s0 + $0x10] sm:$0xff]  ;;  %v25_v51 = vld [vmem:[%s1151_s0 + $0x18] sm:$0xff] }
   0xd   :  { %747 = vmatpush3.bf16.msra.mxu1 %v744_v9  ;;  %713 = vmatprep.subr.bf16.mxu0 %v712_v23  ;;  %v26_v52 = vld [vmem:[%s1151_s0 + $0x20] sm:$0xff]  ;;  %v27_v53 = vld [vmem:[%s1151_s0 + $0x28] sm:$0xff]  ;;  %v28_v54 = vld [vmem:[%s1151_s0 + $0x30] sm:$0xff] }
   0xe   :  { %749 = vmatprep.subr.bf16.mxu1 %v748_v20  ;;  %v29_v55 = vld [vmem:[%s1151_s0 + $0x38] sm:$0xff]  ;;  %v30_v56 = vld [vmem:[%s1151_s0 + $0x40] sm:$0xff]  ;;  %v31_v57 = vld [vmem:[%s1151_s0 + $0x48] sm:$0xff] }
   0xf   :  { %v32_v58 = vld [vmem:[%s1151_s0 + $0x50] sm:$0xff]  ;;  %v33_v59 = vld [vmem:[%s1151_s0 + $0x58] sm:$0xff]  ;;  %v34_v60 = vld [vmem:[%s1151_s0 + $0x60] sm:$0xff] }
  0x10   :  { %715 = vmatpush3.bf16.msra.mxu0 %v712_v23  ;;  %v35_v61 = vld [vmem:[%s1151_s0 + $0x68] sm:$0xff]  ;;  %v36_v62 = vld [vmem:[%s1151_s0 + $0x70] sm:$0xff]  ;;  %v37_v63 = vld [vmem:[%s1151_s0 + $0x78] sm:$0xff] }
  0x11   :  { %751 = vmatpush3.bf16.msra.mxu1 %v748_v20  ;;  %717 = vmatprep.subr.bf16.mxu0 %v716_v29  ;;  %v1014_v0 = vld [vmem:[%s1152_s4] ss:$0 sm:$0xff] }
  0x12   :  { %753 = vmatprep.subr.bf16.mxu1 %v752_v26  ;;  %v1021_v6 = vld [vmem:[%s1153_s2] ss:$0 sm:$0xff] }
  0x14   :  { %719 = vmatpush3.bf16.msra.mxu0 %v716_v29 }
  0x15   :  { %755 = vmatpush3.bf16.msra.mxu1 %v752_v26  ;;  %721 = vmatprep.subr.bf16.mxu0 %v720_v35 }
  0x16   :  { %757 = vmatprep.subr.bf16.mxu1 %v756_v32 }
  0x18   :  { %723 = vmatpush3.bf16.msra.mxu0 %v720_v35 }
  0x19   :  { %759 = vmatpush3.bf16.msra.mxu1 %v756_v32  ;;  %725 = vmatprep.subr.bf16.mxu0 %v724_v41 }
  0x1a   :  { %761 = vmatprep.subr.bf16.mxu1 %v760_v38 }
  0x1c   :  { %727 = vmatpush3.bf16.msra.mxu0 %v724_v41 }
  0x1d   :  { %763 = vmatpush3.bf16.msra.mxu1 %v760_v38  ;;  %729 = vmatprep.subr.bf16.mxu0 %v728_v45 }
  0x1e   :  { %765 = vmatprep.subr.bf16.mxu1 %v764_v44 }
  0x20   :  { %731 = vmatpush3.bf16.msra.mxu0 %v728_v45 }
  0x21   :  { %767 = vmatpush3.bf16.msra.mxu1 %v764_v44  ;;  %733 = vmatprep.subr.bf16.mxu0 %v732_v48 }
  0x24   :  { %681 = vmatmul.mubr.f32.vlgmr.msra.gmra.mrb[0].mxu1 %v23_v49  ;;  %735 = vmatpush3.bf16.msra.mxu0 %v732_v48 }
  0x25   :  { %683 = vmatprep.mubr.f32.mxu1 %v24_v50 }
  0x27   :  { %625 = vmatmul.mubr.f32.vlgmr.msra.gmra.mrb[0].mxu0 %v23_v49 }
  0x28   :  { %684 = vmatmul.mubr.f32.gmra.mrb[2].mxu1 %v25_v51  ;;  %627 = vmatprep.mubr.f32.mxu0 %v24_v50 }
  0x29   :  { %686 = vmatprep.mubr.f32.mxu1 %v26_v52 }
  0x2b   :  { %628 = vmatmul.mubr.f32.gmra.mrb[2].mxu0 %v25_v51 }
  0x2c   :  { %687 = vmatmul.mubr.f32.gmra.mrb[4].mxu1 %v27_v53  ;;  %630 = vmatprep.mubr.f32.mxu0 %v26_v52 }
  0x2d   :  { %689 = vmatprep.mubr.f32.mxu1 %v28_v54 }
  0x2f   :  { %631 = vmatmul.mubr.f32.gmra.mrb[4].mxu0 %v27_v53 }
  0x30   :  { %690 = vmatmul.mubr.f32.gmra.mrb[6].mxu1 %v29_v55  ;;  %633 = vmatprep.mubr.f32.mxu0 %v28_v54 }
  0x31   :  { %692 = vmatprep.mubr.f32.mxu1 %v30_v56 }
  0x33   :  { %634 = vmatmul.mubr.f32.gmra.mrb[6].mxu0 %v29_v55 }
  0x34   :  { %693 = vmatmul.mubr.f32.gmra.mrb[8].mxu1 %v31_v57  ;;  %636 = vmatprep.mubr.f32.mxu0 %v30_v56 }
  0x35   :  { %695 = vmatprep.mubr.f32.mxu1 %v32_v58 }
  0x37   :  { %637 = vmatmul.mubr.f32.gmra.mrb[8].mxu0 %v31_v57 }
  0x38   :  { %696 = vmatmul.mubr.f32.gmra.mrb[10].mxu1 %v33_v59  ;;  %639 = vmatprep.mubr.f32.mxu0 %v32_v58 }
  0x39   :  { %698 = vmatprep.mubr.f32.mxu1 %v34_v60 }
  0x3b   :  { %640 = vmatmul.mubr.f32.gmra.mrb[10].mxu0 %v33_v59 }
  0x3c   :  { %699 = vmatmul.mubr.f32.gmra.mrb[12].mxu1 %v35_v61  ;;  %642 = vmatprep.mubr.f32.mxu0 %v34_v60 }
  0x3d   :  { %701 = vmatprep.mubr.f32.mxu1 %v36_v62 }
  0x3f   :  { %643 = vmatmul.mubr.f32.gmra.mrb[12].mxu0 %v35_v61 }
  0x40   :  { %702 = vmatmul.mubr.f32.gmra.mrb[14].mxu1 %v37_v63  ;;  %645 = vmatprep.mubr.f32.mxu0 %v36_v62 }
  0x43   :  { %646 = vmatmul.mubr.f32.gmra.mrb[14].mxu0 %v37_v63 }
  0xf7   :  { %v682_v1 = vpop.f32.mrb[0].mxu1 }
  0xf8   :  { %v301_v2 = vadd.f32 %v682_v1, %v1014_v0  ;;  %v295_v3 = vpop.f32.mrb[1].mxu1 }
  0xf9   :  { %v296_v4 = vadd.f32 %v1014_v0, %v295_v3 }
  0xfa   :  { %v513_v5 = vmul.f32 -1.442695, %v301_v2  ;;  %v626_v11 = vpop.f32.mrb[0].mxu0 }
  0xfb   :  { %v512_v7 = vmul.f32 -1.442695, %v296_v4  ;;  %v685_v8 = vpop.f32.mrb[2].mxu1  ;;  %v133_v13 = vadd.f32 %v626_v11, %v1021_v6  ;;  %v127_v14 = vpop.f32.mrb[1].mxu0 }
  0xfc   :  { %768 = vpow2.f32 %v513_v5  ;;  %v311_v9 = vadd.f32 %v685_v8, %v1014_v0  ;;  %v305_v10 = vpop.f32.mrb[3].mxu1  ;;  %v128_v16 = vadd.f32 %v1021_v6, %v127_v14 }
  0xfd   :  { %770 = vpow2.f32 %v512_v7  ;;  %v306_v12 = vadd.f32 %v1014_v0, %v305_v10  ;;  %375 = vst [vmem:[%s1154_s5 + $0x8] sm:$0xff] %v133_v13 }
  0xfe   :  { %v515_v15 = vmul.f32 -1.442695, %v311_v9  ;;  %374 = vst [vmem:[%s1154_s5] sm:$0xff] %v128_v16  ;;  %v629_v21 = vpop.f32.mrb[2].mxu0 }
  0xff   :  { %v514_v17 = vmul.f32 -1.442695, %v306_v12  ;;  %v688_v18 = vpop.f32.mrb[4].mxu1  ;;  %v143_v23 = vadd.f32 %v629_v21, %v1021_v6  ;;  %v137_v24 = vpop.f32.mrb[3].mxu0 }
 0x100   :  { %772 = vpow2.f32 %v515_v15  ;;  %v321_v19 = vadd.f32 %v688_v18, %v1014_v0  ;;  %v315_v20 = vpop.f32.mrb[5].mxu1  ;;  %v138_v26 = vadd.f32 %v1021_v6, %v137_v24 }
 0x101   :  { %774 = vpow2.f32 %v514_v17  ;;  %v316_v22 = vadd.f32 %v1014_v0, %v315_v20  ;;  %377 = vst [vmem:[%s1154_s5 + $0x18] sm:$0xff] %v143_v23 }
 0x102   :  { %v517_v25 = vmul.f32 -1.442695, %v321_v19  ;;  %376 = vst [vmem:[%s1154_s5 + $0x10] sm:$0xff] %v138_v26  ;;  %v632_v31 = vpop.f32.mrb[4].mxu0 }
 0x103   :  { %v516_v27 = vmul.f32 -1.442695, %v316_v22  ;;  %v691_v28 = vpop.f32.mrb[6].mxu1  ;;  %v153_v33 = vadd.f32 %v632_v31, %v1021_v6  ;;  %v147_v34 = vpop.f32.mrb[5].mxu0 }
 0x104   :  { %776 = vpow2.f32 %v517_v25  ;;  %v331_v29 = vadd.f32 %v691_v28, %v1014_v0  ;;  %v325_v30 = vpop.f32.mrb[7].mxu1  ;;  %v148_v37 = vadd.f32 %v1021_v6, %v147_v34 }
 0x105   :  { %778 = vpow2.f32 %v516_v27  ;;  %v326_v32 = vadd.f32 %v1014_v0, %v325_v30  ;;  %379 = vst [vmem:[%s1154_s5 + $0x28] sm:$0xff] %v153_v33 }
 0x106   :  { %v769_v35 = vpop.eup %768  ;;  %v519_v36 = vmul.f32 -1.442695, %v331_v29  ;;  %378 = vst [vmem:[%s1154_s5 + $0x20] sm:$0xff] %v148_v37  ;;  %v635_v45 = vpop.f32.mrb[6].mxu0 }
 0x107   :  { %v771_v38 = vpop.eup %770  ;;  %v439_v39 = vadd.f32 1.0, %v769_v35  ;;  %v518_v40 = vmul.f32 -1.442695, %v326_v32  ;;  %v694_v41 = vpop.f32.mrb[8].mxu1  ;;  %v163_v47 = vadd.f32 %v635_v45, %v1021_v6 }
 0x108   :  { %v438_v42 = vadd.f32 1.0, %v771_v38  ;;  %780 = vpow2.f32 %v519_v36  ;;  %v341_v43 = vadd.f32 %v694_v41, %v1014_v0  ;;  %v335_v44 = vpop.f32.mrb[9].mxu1  ;;  %v157_v48 = vpop.f32.mrb[7].mxu0 }
 0x109   :  { %782 = vrcp.f32 %v439_v39  ;;  %v336_v46 = vadd.f32 %v1014_v0, %v335_v44  ;;  %v158_v51 = vadd.f32 %v1021_v6, %v157_v48  ;;  %381 = vst [vmem:[%s1154_s5 + $0x38] sm:$0xff] %v163_v47 }
 0x10a   :  { %v773_v49 = vpop.eup %772  ;;  %784 = vrcp.f32 %v438_v42  ;;  %v521_v50 = vmul.f32 -1.442695, %v341_v43  ;;  %v638_v59 = vpop.f32.mrb[8].mxu0 }
 0x10b   :  { %v775_v52 = vpop.eup %774  ;;  %v441_v53 = vadd.f32 1.0, %v773_v49  ;;  %786 = vpow2.f32 %v518_v40  ;;  %v520_v54 = vmul.f32 -1.442695, %v336_v46  ;;  %v697_v55 = vpop.f32.mrb[10].mxu1  ;;  %380 = vst [vmem:[%s1154_s5 + $0x30] sm:$0xff] %v158_v51  ;;  %v173_v61 = vadd.f32 %v638_v59, %v1021_v6 }
 0x10c   :  { %v440_v56 = vadd.f32 1.0, %v775_v52  ;;  %788 = vpow2.f32 %v521_v50  ;;  %v351_v57 = vadd.f32 %v697_v55, %v1014_v0  ;;  %v345_v58 = vpop.f32.mrb[11].mxu1  ;;  %v167_v62 = vpop.f32.mrb[9].mxu0 }
 0x10d   :  { %790 = vrcp.f32 %v441_v53  ;;  %v346_v60 = vadd.f32 %v1014_v0, %v345_v58  ;;  %v168_v2 = vadd.f32 %v1021_v6, %v167_v62  ;;  %383 = vst [vmem:[%s1154_s5 + $0x48] sm:$0xff] %v173_v61 }
 0x10e   :  { %v777_v63 = vpop.eup %776  ;;  %792 = vrcp.f32 %v440_v56  ;;  %v523_v1 = vmul.f32 -1.442695, %v351_v57  ;;  %v641_v11 = vpop.f32.mrb[10].mxu0 }
 0x10f   :  { %v779_v3 = vpop.eup %778  ;;  %v443_v4 = vadd.f32 1.0, %v777_v63  ;;  %794 = vpow2.f32 %v520_v54  ;;  %v522_v5 = vmul.f32 -1.442695, %v346_v60  ;;  %v700_v7 = vpop.f32.mrb[12].mxu1  ;;  %382 = vst [vmem:[%s1154_s5 + $0x40] sm:$0xff] %v168_v2  ;;  %v183_v13 = vadd.f32 %v641_v11, %v1021_v6 }
 0x110   :  { %v442_v8 = vadd.f32 1.0, %v779_v3  ;;  %796 = vpow2.f32 %v523_v1  ;;  %v361_v9 = vadd.f32 %v700_v7, %v1014_v0  ;;  %v355_v10 = vpop.f32.mrb[13].mxu1  ;;  %v177_v14 = vpop.f32.mrb[11].mxu0 }
 0x111   :  { %798 = vrcp.f32 %v443_v4  ;;  %v356_v12 = vadd.f32 %v1014_v0, %v355_v10  ;;  %v178_v17 = vadd.f32 %v1021_v6, %v177_v14  ;;  %385 = vst [vmem:[%s1154_s5 + $0x58] sm:$0xff] %v183_v13 }
 0x112   :  { %v781_v15 = vpop.eup %780  ;;  %800 = vrcp.f32 %v442_v8  ;;  %v525_v16 = vmul.f32 -1.442695, %v361_v9  ;;  %v644_v25 = vpop.f32.mrb[12].mxu0 }
 0x113   :  { %v783_v18 = vpop.eup %782  ;;  %v445_v19 = vadd.f32 1.0, %v781_v15  ;;  %802 = vpow2.f32 %v522_v5  ;;  %v524_v20 = vmul.f32 -1.442695, %v356_v12  ;;  %v703_v21 = vpop.f32.mrb[14].mxu1  ;;  %384 = vst [vmem:[%s1154_s5 + $0x50] sm:$0xff] %v178_v17  ;;  %v193_v28 = vadd.f32 %v644_v25, %v1021_v6 }
 0x114   :  { %v785_v22 = vpop.eup %784  ;;  %487 = vst [vmem:[%s1155_s6 + $0x8] sm:$0xff] %v783_v18  ;;  %804 = vpow2.f32 %v525_v16  ;;  %v371_v23 = vadd.f32 %v703_v21, %v1014_v0  ;;  %v365_v24 = vpop.f32.mrb[15].mxu1 }
 0x115   :  { %v787_v26 = vpop.eup %786  ;;  %486 = vst [vmem:[%s1155_s6] sm:$0xff] %v785_v22  ;;  %806 = vrcp.f32 %v445_v19  ;;  %v366_v27 = vadd.f32 %v1014_v0, %v365_v24  ;;  %v187_v29 = vpop.f32.mrb[13].mxu0  ;;  %387 = vst [vmem:[%s1154_s5 + $0x68] sm:$0xff] %v193_v28 }
 0x116   :  { %v789_v30 = vpop.eup %788  ;;  %v444_v31 = vadd.f32 1.0, %v787_v26  ;;  %808 = vpow2.f32 %v524_v20  ;;  %v527_v32 = vmul.f32 -1.442695, %v371_v23  ;;  %v188_v33 = vadd.f32 %v1021_v6, %v187_v29  ;;  %v647_v0 = vpop.f32.mrb[14].mxu0 }
 0x117   :  { %v791_v34 = vpop.eup %790  ;;  %v447_v35 = vadd.f32 1.0, %v789_v30  ;;  %v526_v36 = vmul.f32 -1.442695, %v366_v27  ;;  %v203_v39 = vadd.f32 %v647_v0, %v1021_v6  ;;  %v197_v40 = vpop.f32.mrb[15].mxu0 }
 0x118   :  { %v793_v37 = vpop.eup %792  ;;  %489 = vst [vmem:[%s1155_s6 + $0x18] sm:$0xff] %v791_v34  ;;  %810 = vrcp.f32 %v444_v31  ;;  %386 = vst [vmem:[%s1154_s5 + $0x60] sm:$0xff] %v188_v33  ;;  %v198_v43 = vadd.f32 %v1021_v6, %v197_v40 }
 0x119   :  { %v795_v38 = vpop.eup %794  ;;  %488 = vst [vmem:[%s1155_s6 + $0x10] sm:$0xff] %v793_v37  ;;  %812 = vrcp.f32 %v447_v35  ;;  %389 = vst [vmem:[%s1154_s5 + $0x78] sm:$0xff] %v203_v39 }
 0x11a   :  { %v797_v41 = vpop.eup %796  ;;  %v446_v42 = vadd.f32 1.0, %v795_v38  ;;  %814 = vpow2.f32 %v527_v32  ;;  %388 = vst [vmem:[%s1154_s5 + $0x70] sm:$0xff] %v198_v43 }
 0x11b   :  { %v799_v44 = vpop.eup %798  ;;  %v449_v45 = vadd.f32 1.0, %v797_v41  ;;  %816 = vpow2.f32 %v526_v36 }
 0x11c   :  { %v801_v46 = vpop.eup %800  ;;  %491 = vst [vmem:[%s1155_s6 + $0x28] sm:$0xff] %v799_v44  ;;  %818 = vrcp.f32 %v446_v42 }
 0x11d   :  { %v803_v47 = vpop.eup %802  ;;  %490 = vst [vmem:[%s1155_s6 + $0x20] sm:$0xff] %v801_v46  ;;  %820 = vrcp.f32 %v449_v45 }
 0x11e   :  { %v805_v6 = vpop.eup %804  ;;  %v448_v48 = vadd.f32 1.0, %v803_v47 }
 0x11f   :  { %v807_v49 = vpop.eup %806  ;;  %v451_v50 = vadd.f32 1.0, %v805_v6 }
 0x120   :  { %v809_v51 = vpop.eup %808  ;;  %493 = vst [vmem:[%s1155_s6 + $0x38] sm:$0xff] %v807_v49  ;;  %822 = vrcp.f32 %v448_v48 }
 0x121   :  { %824 = vrcp.f32 %v451_v50  ;;  %v450_v52 = vadd.f32 1.0, %v809_v51 }
 0x122   :  { %v811_v53 = vpop.eup %810 }
 0x123   :  { %v813_v54 = vpop.eup %812  ;;  %492 = vst [vmem:[%s1155_s6 + $0x30] sm:$0xff] %v811_v53  ;;  %826 = vrcp.f32 %v450_v52 }
 0x124   :  { %v815_v55 = vpop.eup %814  ;;  %495 = vst [vmem:[%s1155_s6 + $0x48] sm:$0xff] %v813_v54 }
 0x125   :  { %v817_v56 = vpop.eup %816  ;;  %v453_v57 = vadd.f32 1.0, %v815_v55 }
 0x126   :  { %v819_v58 = vpop.eup %818  ;;  %v452_v59 = vadd.f32 1.0, %v817_v56 }
 0x127   :  { %v821_v60 = vpop.eup %820  ;;  %494 = vst [vmem:[%s1155_s6 + $0x40] sm:$0xff] %v819_v58  ;;  %828 = vrcp.f32 %v453_v57 }
 0x128   :  { %497 = vst [vmem:[%s1155_s6 + $0x58] sm:$0xff] %v821_v60  ;;  %830 = vrcp.f32 %v452_v59 }
 0x12a   :  { %v823_v61 = vpop.eup %822 }
 0x12b   :  { %v825_v62 = vpop.eup %824  ;;  %496 = vst [vmem:[%s1155_s6 + $0x50] sm:$0xff] %v823_v61 }
 0x12c   :  { %499 = vst [vmem:[%s1155_s6 + $0x68] sm:$0xff] %v825_v62 }
 0x12d   :  { %v827_v63 = vpop.eup %826 }
 0x12e   :  { %498 = vst [vmem:[%s1155_s6 + $0x60] sm:$0xff] %v827_v63 }
 0x131   :  { %v829_v1 = vpop.eup %828 }
 0x132   :  { %v831_v2 = vpop.eup %830  ;;  %501 = vst [vmem:[%s1155_s6 + $0x78] sm:$0xff] %v829_v1 }
 0x133   :  { %500 = vst [vmem:[%s1155_s6 + $0x70] sm:$0xff] %v831_v2 }

// kernel: gated_graph_conv.3
= control target key start
LH: loop header
LB: loop body
LE: loop exit
PB: predicated region body
PF: predicated region fallthrough
CT: control target
= control target key end

     0   :  { %s678_s1 = inlined_call_operand.vmem [shape: f32[128,128], index: 1, kind: input, shape index: {}]   ;;  %s679_s0 = inlined_call_operand.vmem [shape: f32[128,128], index: 0, kind: input, shape index: {}]   ;;  %s680_s2 = inlined_call_operand.vmem [shape: f32[128,128], index: 2, kind: input, shape index: {}]   ;;  %s681_s3 = inlined_call_operand.vmem [shape: f32[128,128], index: 3, kind: output, shape index: {}]  }
   0x1   :  { %v66_v0 = vld [vmem:[%s678_s1] sm:$0xff]  ;;  %v67_v1 = vld [vmem:[%s678_s1 + $0x8] sm:$0xff]  ;;  %v68_v2 = vld [vmem:[%s678_s1 + $0x10] sm:$0xff] }
   0x2   :  { %v418_v3 = vpack.c.bf16 %v67_v1, %v66_v0  ;;  %v69_v4 = vld [vmem:[%s678_s1 + $0x18] sm:$0xff]  ;;  %v70_v6 = vld [vmem:[%s678_s1 + $0x20] sm:$0xff]  ;;  %v71_v7 = vld [vmem:[%s678_s1 + $0x28] sm:$0xff] }
   0x3   :  { %v422_v5 = vpack.c.bf16 %v69_v4, %v68_v2  ;;  %v426_v8 = vpack.c.bf16 %v71_v7, %v70_v6  ;;  %v50_v9 = vld [vmem:[%s679_s0] sm:$0xff]  ;;  %v72_v11 = vld [vmem:[%s678_s1 + $0x30] sm:$0xff]  ;;  %v73_v12 = vld [vmem:[%s678_s1 + $0x38] sm:$0xff] }
   0x4   :  { %419 = vmatprep.subr.bf16.mxu0 %v418_v3  ;;  %450 = vmatprep.subr.bf16.mxu1 %v418_v3  ;;  %v58_v10 = vld [vmem:[%s679_s0 + $0x40] sm:$0xff]  ;;  %v430_v13 = vpack.c.bf16 %v73_v12, %v72_v11  ;;  %v75_v15 = vld [vmem:[%s678_s1 + $0x48] sm:$0xff]  ;;  %v76_v17 = vld [vmem:[%s678_s1 + $0x50] sm:$0xff] }
   0x5   :  { %421 = vmatpush3.bf16.msra.mxu0 %v418_v3  ;;  %458 = vmatpush3.bf16.msra.mxu1 %v418_v3  ;;  %v74_v14 = vld [vmem:[%s678_s1 + $0x40] sm:$0xff]  ;;  %v77_v18 = vld [vmem:[%s678_s1 + $0x58] sm:$0xff]  ;;  %v79_v21 = vld [vmem:[%s678_s1 + $0x68] sm:$0xff] }
   0x6   :  { %423 = vmatprep.subr.bf16.mxu0 %v422_v5  ;;  %451 = vmatprep.subr.bf16.mxu1 %v422_v5  ;;  %v434_v16 = vpack.c.bf16 %v75_v15, %v74_v14  ;;  %v438_v19 = vpack.c.bf16 %v77_v18, %v76_v17  ;;  %v78_v20 = vld [vmem:[%s678_s1 + $0x60] sm:$0xff]  ;;  %v80_v23 = vld [vmem:[%s678_s1 + $0x70] sm:$0xff]  ;;  %v81_v24 = vld [vmem:[%s678_s1 + $0x78] sm:$0xff] }
   0x7   :  { %394 = vmatprep.mubr.f32.mxu0 %v50_v9  ;;  %406 = vmatprep.mubr.f32.mxu1 %v58_v10  ;;  %v442_v22 = vpack.c.bf16 %v79_v21, %v78_v20  ;;  %v446_v25 = vpack.c.bf16 %v81_v24, %v80_v23  ;;  %v51_v26 = vld [vmem:[%s679_s0 + $0x8] sm:$0xff]  ;;  %v52_v28 = vld [vmem:[%s679_s0 + $0x10] sm:$0xff]  ;;  %v53_v30 = vld [vmem:[%s679_s0 + $0x18] sm:$0xff] }
   0x8   :  { %v59_v27 = vld [vmem:[%s679_s0 + $0x48] sm:$0xff]  ;;  %v60_v29 = vld [vmem:[%s679_s0 + $0x50] sm:$0xff]  ;;  %v61_v31 = vld [vmem:[%s679_s0 + $0x58] sm:$0xff] }
   0x9   :  { %425 = vmatpush3.bf16.msra.mxu0 %v422_v5  ;;  %459 = vmatpush3.bf16.msra.mxu1 %v422_v5  ;;  %v54_v32 = vld [vmem:[%s679_s0 + $0x20] sm:$0xff]  ;;  %v55_v34 = vld [vmem:[%s679_s0 + $0x28] sm:$0xff]  ;;  %v56_v36 = vld [vmem:[%s679_s0 + $0x30] sm:$0xff] }
   0xa   :  { %427 = vmatprep.subr.bf16.mxu0 %v426_v8  ;;  %452 = vmatprep.subr.bf16.mxu1 %v426_v8  ;;  %v62_v33 = vld [vmem:[%s679_s0 + $0x60] sm:$0xff]  ;;  %v63_v35 = vld [vmem:[%s679_s0 + $0x68] sm:$0xff]  ;;  %v64_v37 = vld [vmem:[%s679_s0 + $0x70] sm:$0xff] }
   0xb   :  { %v57_v38 = vld [vmem:[%s679_s0 + $0x38] sm:$0xff]  ;;  %v279_v40 = vld [vmem:[%s680_s2 + $0x8] sm:$0xff]  ;;  %v278_v42 = vld [vmem:[%s680_s2] sm:$0xff] }
   0xc   :  { %v65_v39 = vld [vmem:[%s679_s0 + $0x78] sm:$0xff]  ;;  %v287_v41 = vld [vmem:[%s680_s2 + $0x48] sm:$0xff]  ;;  %v286_v43 = vld [vmem:[%s680_s2 + $0x40] sm:$0xff] }
   0xd   :  { %429 = vmatpush3.bf16.msra.mxu0 %v426_v8  ;;  %460 = vmatpush3.bf16.msra.mxu1 %v426_v8  ;;  %v281_v52 = vld [vmem:[%s680_s2 + $0x18] sm:$0xff]  ;;  %v280_v54 = vld [vmem:[%s680_s2 + $0x10] sm:$0xff]  ;;  %v283_v0 = vld [vmem:[%s680_s2 + $0x28] sm:$0xff] }
   0xe   :  { %431 = vmatprep.subr.bf16.mxu0 %v430_v13  ;;  %453 = vmatprep.subr.bf16.mxu1 %v430_v13  ;;  %v289_v53 = vld [vmem:[%s680_s2 + $0x58] sm:$0xff]  ;;  %v288_v55 = vld [vmem:[%s680_s2 + $0x50] sm:$0xff]  ;;  %v291_v1 = vld [vmem:[%s680_s2 + $0x68] sm:$0xff] }
   0xf   :  { %v282_v2 = vld [vmem:[%s680_s2 + $0x20] sm:$0xff]  ;;  %v285_v12 = vld [vmem:[%s680_s2 + $0x38] sm:$0xff]  ;;  %v284_v14 = vld [vmem:[%s680_s2 + $0x30] sm:$0xff] }
  0x10   :  { %v290_v3 = vld [vmem:[%s680_s2 + $0x60] sm:$0xff]  ;;  %v292_v15 = vld [vmem:[%s680_s2 + $0x70] sm:$0xff] }
  0x11   :  { %433 = vmatpush3.bf16.msra.mxu0 %v430_v13  ;;  %461 = vmatpush3.bf16.msra.mxu1 %v430_v13  ;;  %v293_v13 = vld [vmem:[%s680_s2 + $0x78] sm:$0xff] }
  0x12   :  { %435 = vmatprep.subr.bf16.mxu0 %v434_v16  ;;  %454 = vmatprep.subr.bf16.mxu1 %v434_v16 }
  0x15   :  { %437 = vmatpush3.bf16.msra.mxu0 %v434_v16  ;;  %462 = vmatpush3.bf16.msra.mxu1 %v434_v16 }
  0x16   :  { %439 = vmatprep.subr.bf16.mxu0 %v438_v19  ;;  %455 = vmatprep.subr.bf16.mxu1 %v438_v19 }
  0x19   :  { %441 = vmatpush3.bf16.msra.mxu0 %v438_v19  ;;  %463 = vmatpush3.bf16.msra.mxu1 %v438_v19 }
  0x1a   :  { %443 = vmatprep.subr.bf16.mxu0 %v442_v22  ;;  %456 = vmatprep.subr.bf16.mxu1 %v442_v22 }
  0x1d   :  { %445 = vmatpush3.bf16.msra.mxu0 %v442_v22  ;;  %464 = vmatpush3.bf16.msra.mxu1 %v442_v22 }
  0x1e   :  { %447 = vmatprep.subr.bf16.mxu0 %v446_v25  ;;  %457 = vmatprep.subr.bf16.mxu1 %v446_v25 }
  0x21   :  { %449 = vmatpush3.bf16.msra.mxu0 %v446_v25  ;;  %465 = vmatpush3.bf16.msra.mxu1 %v446_v25 }
  0x24   :  { %395 = vmatmul.mubr.f32.vlgmr.msra.gmra.mrb[0].mxu0 %v51_v26  ;;  %407 = vmatmul.mubr.f32.vlgmr.msra.gmra.mrb[0].mxu1 %v59_v27 }
  0x25   :  { %397 = vmatprep.mubr.f32.mxu0 %v52_v28  ;;  %409 = vmatprep.mubr.f32.mxu1 %v60_v29 }
  0x28   :  { %398 = vmatmul.mubr.f32.gmra.mrb[2].mxu0 %v53_v30  ;;  %410 = vmatmul.mubr.f32.gmra.mrb[2].mxu1 %v61_v31 }
  0x29   :  { %400 = vmatprep.mubr.f32.mxu0 %v54_v32  ;;  %412 = vmatprep.mubr.f32.mxu1 %v62_v33 }
  0x2c   :  { %401 = vmatmul.mubr.f32.gmra.mrb[4].mxu0 %v55_v34  ;;  %413 = vmatmul.mubr.f32.gmra.mrb[4].mxu1 %v63_v35 }
  0x2d   :  { %403 = vmatprep.mubr.f32.mxu0 %v56_v36  ;;  %415 = vmatprep.mubr.f32.mxu1 %v64_v37 }
  0x30   :  { %404 = vmatmul.mubr.f32.gmra.mrb[6].mxu0 %v57_v38  ;;  %416 = vmatmul.mubr.f32.gmra.mrb[6].mxu1 %v65_v39 }
  0xf7   :  { %v396_v44 = vpop.f32.mrb[0].mxu0  ;;  %v408_v45 = vpop.f32.mrb[0].mxu1 }
  0xf8   :  { %v295_v46 = vmul.f32 %v396_v44, %v279_v40  ;;  %v303_v47 = vmul.f32 %v408_v45, %v287_v41  ;;  %v148_v48 = vpop.f32.mrb[1].mxu0  ;;  %v188_v49 = vpop.f32.mrb[1].mxu1 }
  0xf9   :  { %v294_v50 = vmul.f32 %v278_v42, %v148_v48  ;;  %v302_v51 = vmul.f32 %v286_v43, %v188_v49 }
  0xfa   :  { %311 = vst [vmem:[%s681_s3 + $0x8] sm:$0xff] %v295_v46  ;;  %319 = vst [vmem:[%s681_s3 + $0x48] sm:$0xff] %v303_v47 }
  0xfb   :  { %310 = vst [vmem:[%s681_s3] sm:$0xff] %v294_v50  ;;  %318 = vst [vmem:[%s681_s3 + $0x40] sm:$0xff] %v302_v51  ;;  %v399_v56 = vpop.f32.mrb[2].mxu0  ;;  %v411_v57 = vpop.f32.mrb[2].mxu1 }
  0xfc   :  { %v297_v58 = vmul.f32 %v399_v56, %v281_v52  ;;  %v305_v59 = vmul.f32 %v411_v57, %v289_v53  ;;  %v158_v60 = vpop.f32.mrb[3].mxu0  ;;  %v198_v61 = vpop.f32.mrb[3].mxu1 }
  0xfd   :  { %v296_v62 = vmul.f32 %v280_v54, %v158_v60  ;;  %v304_v63 = vmul.f32 %v288_v55, %v198_v61 }
  0xfe   :  { %313 = vst [vmem:[%s681_s3 + $0x18] sm:$0xff] %v297_v58  ;;  %321 = vst [vmem:[%s681_s3 + $0x58] sm:$0xff] %v305_v59 }
  0xff   :  { %312 = vst [vmem:[%s681_s3 + $0x10] sm:$0xff] %v296_v62  ;;  %320 = vst [vmem:[%s681_s3 + $0x50] sm:$0xff] %v304_v63  ;;  %v402_v4 = vpop.f32.mrb[4].mxu0  ;;  %v414_v5 = vpop.f32.mrb[4].mxu1 }
 0x100   :  { %v299_v6 = vmul.f32 %v402_v4, %v283_v0  ;;  %v307_v7 = vmul.f32 %v414_v5, %v291_v1  ;;  %v168_v8 = vpop.f32.mrb[5].mxu0  ;;  %v208_v9 = vpop.f32.mrb[5].mxu1 }
 0x101   :  { %v298_v10 = vmul.f32 %v282_v2, %v168_v8  ;;  %v306_v11 = vmul.f32 %v290_v3, %v208_v9 }
 0x102   :  { %315 = vst [vmem:[%s681_s3 + $0x28] sm:$0xff] %v299_v6  ;;  %323 = vst [vmem:[%s681_s3 + $0x68] sm:$0xff] %v307_v7 }
 0x103   :  { %314 = vst [vmem:[%s681_s3 + $0x20] sm:$0xff] %v298_v10  ;;  %322 = vst [vmem:[%s681_s3 + $0x60] sm:$0xff] %v306_v11  ;;  %v405_v16 = vpop.f32.mrb[6].mxu0  ;;  %v417_v17 = vpop.f32.mrb[6].mxu1 }
 0x104   :  { %v301_v18 = vmul.f32 %v405_v16, %v285_v12  ;;  %v309_v19 = vmul.f32 %v417_v17, %v293_v13  ;;  %v178_v20 = vpop.f32.mrb[7].mxu0  ;;  %v218_v21 = vpop.f32.mrb[7].mxu1 }
 0x105   :  { %v300_v22 = vmul.f32 %v284_v14, %v178_v20  ;;  %v308_v23 = vmul.f32 %v292_v15, %v218_v21 }
 0x106   :  { %317 = vst [vmem:[%s681_s3 + $0x38] sm:$0xff] %v301_v18  ;;  %325 = vst [vmem:[%s681_s3 + $0x78] sm:$0xff] %v309_v19 }
 0x107   :  { %316 = vst [vmem:[%s681_s3 + $0x30] sm:$0xff] %v300_v22  ;;  %324 = vst [vmem:[%s681_s3 + $0x70] sm:$0xff] %v308_v23 }

</bundles_post_ra>
